<compile_context>
chip_gen: v5e
topology: v5e:2x2
jax: 0.10.0
libtpu: 0.0.40
codegen_flags: <defaults>
</compile_context>

<pallas_src>
import jax
import jax.numpy as jnp
from jax.experimental import pallas as pl
from jax.experimental.pallas import tpu as pltpu

SUBLANE = 8  # f32 sublane count


def _round_up(x, m):
    return (x + m - 1) // m * m


def _qnet_kernel(x_ref,
                 w1_ref, b1_ref,
                 w2_ref, b2_ref,
                 w3_ref, b3_ref,
                 w4_ref, b4_ref,
                 o_ref):
    """Fused forward for one batch tile: 3x (Linear + ReLU) + final Linear.

    Matmul operands are in the weights' dtype (f32 or bf16); accumulation,
    bias-add and ReLU stay in f32.
    """
    compute_dtype = w1_ref.dtype
    x = x_ref[...].astype(compute_dtype)

    # Layer 1: input -> hidden, ReLU
    h = jnp.dot(x, w1_ref[...], preferred_element_type=jnp.float32) + b1_ref[...]
    h = jnp.maximum(h, 0.0)

    # Layer 2: hidden -> hidden//2, ReLU
    h = jnp.dot(h.astype(compute_dtype), w2_ref[...],
                preferred_element_type=jnp.float32) + b2_ref[...]
    h = jnp.maximum(h, 0.0)

    # Layer 3: hidden//2 -> hidden//2, ReLU
    h = jnp.dot(h.astype(compute_dtype), w3_ref[...],
                preferred_element_type=jnp.float32) + b3_ref[...]
    h = jnp.maximum(h, 0.0)

    # Output layer: hidden//2 -> output (no activation)
    out = jnp.dot(h.astype(compute_dtype), w4_ref[...],
                  preferred_element_type=jnp.float32) + b4_ref[...]
    o_ref[...] = out.astype(o_ref.dtype)


def prepare_qnet_params(params, weights_dtype=jnp.float32):
    """One-time param preparation (outside the hot path).

    Casts weights to `weights_dtype`, keeps biases in f32 as [1, out_features].
    """
    prepared = []
    for (w, b) in params:
        w = jnp.asarray(w, weights_dtype)
        b = jnp.asarray(b, jnp.float32).reshape(1, -1)
        prepared.append((w, b))
    return tuple(prepared)


def linear_qnet_forward(x, prepared_params, *, block_b=1024):
    """Fused MLP forward. x: [B, input_size] (or [input_size]) -> [B, output_size] f32."""
    (w1, b1), (w2, b2), (w3, b3), (w4, b4) = prepared_params

    squeeze = x.ndim == 1
    if squeeze:
        x = x[None, :]
    B, F = x.shape
    H1 = w1.shape[1]
    H2 = w2.shape[1]
    out_size = w4.shape[1]

    # ---- Batch tiling: no batch padding, partial last tile handled by Pallas.
    # Target >= 2 grid steps when possible so "parallel" shards across v7x TCs.
    if B <= SUBLANE:
        tb = B                                      # single block == full batch dim
    else:
        tb = min(_round_up(block_b, SUBLANE),
                 _round_up(pl.cdiv(B, 2), SUBLANE))
        tb = max(tb, SUBLANE)
    grid = (pl.cdiv(B, tb),)

    # ---- BlockSpecs: x/out tiled over batch; weights/biases resident in VMEM.
    def resident(a):
        return pl.BlockSpec(a.shape, lambda i: (0, 0))

    in_specs = [
        pl.BlockSpec((tb, F), lambda i: (i, 0)),    # x tile, unpadded features
        resident(w1), resident(b1),
        resident(w2), resident(b2),
        resident(w3), resident(b3),
        resident(w4), resident(b4),
    ]
    out_specs = pl.BlockSpec((tb, out_size), lambda i: (i, 0))   # unpadded output

    # ---- Advisory cost estimate from true (unpadded) shapes. ----------------
    flops = 2 * B * (F * H1 + H1 * H2 + H2 * H2 + H2 * out_size)
    param_bytes = sum(int(a.size) * a.dtype.itemsize
                      for layer in prepared_params for a in layer)
    bytes_accessed = (int(x.size) * x.dtype.itemsize
                      + B * out_size * 4
                      + param_bytes)
    cost = pl.CostEstimate(flops=flops, transcendentals=0,
                           bytes_accessed=bytes_accessed)

    out = pl.pallas_call(
        _qnet_kernel,
        out_shape=jax.ShapeDtypeStruct((B, out_size), jnp.float32),
        grid=grid,
        in_specs=in_specs,
        out_specs=out_specs,
        compiler_params=pltpu.CompilerParams(
            dimension_semantics=("parallel",)),
        cost_estimate=cost,
    )(x, w1, b1, w2, b2, w3, b3, w4, b4)

    return out[0] if squeeze else out


def init_linear_qnet_params(key, input_size, hidden_size, output_size):
    """torch.nn.Linear-style init (uniform +/- 1/sqrt(fan_in)).

    Weights stored [in_features, out_features]; biases [out_features].
    """
    dims = [
        (input_size, hidden_size),
        (hidden_size, hidden_size // 2),
        (hidden_size // 2, hidden_size // 2),
        (hidden_size // 2, output_size),
    ]
    params = []
    for (fan_in, fan_out) in dims:
        key, kw, kb = jax.random.split(key, 3)
        bound = 1.0 / jnp.sqrt(fan_in)
        w = jax.random.uniform(kw, (fan_in, fan_out), jnp.float32, -bound, bound)
        b = jax.random.uniform(kb, (fan_out,), jnp.float32, -bound, bound)
        params.append((w, b))
    return params


def _reference_forward(x, params, compute_dtype=jnp.float32):
    """Plain-JAX reference mirroring the kernel's dtype handling."""
    (w1, b1), (w2, b2), (w3, b3), (w4, b4) = params

    def layer(h, w, b, relu):
        y = jnp.dot(h.astype(compute_dtype), w.astype(compute_dtype),
                    preferred_element_type=jnp.float32) + b.astype(jnp.float32)
        return jnp.maximum(y, 0.0) if relu else y

    h = layer(x, w1, b1, True)
    h = layer(h, w2, b2, True)
    h = layer(h, w3, b3, True)
    return layer(h, w4, b4, False)


# TODO(synk): save()/load() checkpoint I/O is host-side torch serialization, not a kernel.

if __name__ == "__main__":
    # Shapes consistent with the module: input=16, hidden=32 (->16->16), output=4.
    input_size, hidden_size, output_size = 16, 32, 4

    key = jax.random.PRNGKey(0)
    key, kx, kx2 = jax.random.split(key, 3)
    params = init_linear_qnet_params(key, input_size, hidden_size, output_size)

    # --- f32 path, tiny batch (single full-batch block) ----------------------
    x_small = jax.random.normal(kx, (4, input_size), dtype=jnp.float32)
    p_f32 = prepare_qnet_params(params, jnp.float32)
    out_f32 = jax.block_until_ready(linear_qnet_forward(x_small, p_f32))
    ref_f32 = _reference_forward(x_small, params, compute_dtype=jnp.float32)
    assert out_f32.shape == (4, output_size)
    assert jnp.allclose(out_f32, ref_f32, atol=1e-5, rtol=1e-5), "f32 mismatch"

    # --- f32 path, multi-step grid with a partial last tile (B=100 -> tb=56) -
    x_big = jax.random.normal(kx2, (100, input_size), dtype=jnp.float32)
    out_big = jax.block_until_ready(linear_qnet_forward(x_big, p_f32))
    ref_big = _reference_forward(x_big, params, compute_dtype=jnp.float32)
    assert out_big.shape == (100, output_size)
    assert jnp.allclose(out_big, ref_big, atol=1e-5, rtol=1e-5), "partial-tile mismatch"

    # --- bf16 weights + bf16 activation streaming (v6e/v7x MXU-native) -------
    p_bf16 = prepare_qnet_params(params, jnp.bfloat16)
    out_bf16 = jax.block_until_ready(
        linear_qnet_forward(x_small.astype(jnp.bfloat16), p_bf16))
    ref_bf16 = _reference_forward(x_small, params, compute_dtype=jnp.bfloat16)
    assert out_bf16.shape == (4, output_size)
    assert jnp.allclose(out_bf16, ref_bf16, atol=2e-2, rtol=2e-2), "bf16 mismatch"

    print("KERNEL_OK")
</pallas_src>

<mosaic_0001>
module attributes {stable_mosaic.version = 11 : i64} {
  func.func @_qnet_kernel(%arg0: i32, %arg1: memref<4x16xf32, #tpu.memory_space<vmem>>, %arg2: memref<16x32xf32, #tpu.memory_space<vmem>>, %arg3: memref<1x32xf32, #tpu.memory_space<vmem>>, %arg4: memref<32x16xf32, #tpu.memory_space<vmem>>, %arg5: memref<1x16xf32, #tpu.memory_space<vmem>>, %arg6: memref<16x16xf32, #tpu.memory_space<vmem>>, %arg7: memref<1x16xf32, #tpu.memory_space<vmem>>, %arg8: memref<16x4xf32, #tpu.memory_space<vmem>>, %arg9: memref<1x4xf32, #tpu.memory_space<vmem>>, %arg10: memref<4x4xf32, #tpu.memory_space<vmem>>) attributes {dimension_semantics = [#tpu.dimension_semantics<parallel>], iteration_bounds = array<i64: 1>, scalar_prefetch = 0 : i64, scratch_operands = 0 : i64, tpu.core_type = #tpu.core_type<tc>, window_params = [{transform_indices = @transform_0, window_bounds = array<i64: 4, 16>}, {pipeline_mode = #tpu.pipeline_mode<synchronous>, transform_indices = @transform_1, window_bounds = array<i64: 16, 32>}, {pipeline_mode = #tpu.pipeline_mode<synchronous>, transform_indices = @transform_2, window_bounds = array<i64: 1, 32>}, {pipeline_mode = #tpu.pipeline_mode<synchronous>, transform_indices = @transform_3, window_bounds = array<i64: 32, 16>}, {pipeline_mode = #tpu.pipeline_mode<synchronous>, transform_indices = @transform_4, window_bounds = array<i64: 1, 16>}, {pipeline_mode = #tpu.pipeline_mode<synchronous>, transform_indices = @transform_5, window_bounds = array<i64: 16, 16>}, {pipeline_mode = #tpu.pipeline_mode<synchronous>, transform_indices = @transform_6, window_bounds = array<i64: 1, 16>}, {pipeline_mode = #tpu.pipeline_mode<synchronous>, transform_indices = @transform_7, window_bounds = array<i64: 16, 4>}, {pipeline_mode = #tpu.pipeline_mode<synchronous>, transform_indices = @transform_8, window_bounds = array<i64: 1, 4>}, {transform_indices = @transform_9, window_bounds = array<i64: 4, 4>}]} {
    %c0 = arith.constant 0 : index
    %c0_0 = arith.constant 0 : index
    %0 = vector.load %arg1[%c0, %c0_0] : memref<4x16xf32, #tpu.memory_space<vmem>>, vector<4x16xf32>
    %c0_1 = arith.constant 0 : index
    %c0_2 = arith.constant 0 : index
    %1 = vector.load %arg2[%c0_1, %c0_2] : memref<16x32xf32, #tpu.memory_space<vmem>>, vector<16x32xf32>
    %cst = arith.constant dense<0.000000e+00> : vector<4x32xf32>
    %2 = tpu.matmul %0, %1, %cst {dimension_numbers = #tpu.dot_dimension_numbers<[1], [0], [0], [1], [0, 0, 1, 1], [], []>} : vector<4x16xf32>, vector<16x32xf32>, vector<4x32xf32> -> vector<4x32xf32>
    %c0_3 = arith.constant 0 : index
    %c0_4 = arith.constant 0 : index
    %3 = vector.load %arg3[%c0_3, %c0_4] : memref<1x32xf32, #tpu.memory_space<vmem>>, vector<1x32xf32>
    %4 = vector.broadcast %3 : vector<1x32xf32> to vector<4x32xf32>
    %5 = arith.addf %2, %4 : vector<4x32xf32>
    %cst_5 = arith.constant 0.000000e+00 : f32
    %6 = vector.broadcast %cst_5 : f32 to vector<4x32xf32>
    %7 = arith.maximumf %5, %6 : vector<4x32xf32>
    %c0_6 = arith.constant 0 : index
    %c0_7 = arith.constant 0 : index
    %8 = vector.load %arg4[%c0_6, %c0_7] : memref<32x16xf32, #tpu.memory_space<vmem>>, vector<32x16xf32>
    %cst_8 = arith.constant dense<0.000000e+00> : vector<4x16xf32>
    %9 = tpu.matmul %7, %8, %cst_8 {dimension_numbers = #tpu.dot_dimension_numbers<[1], [0], [0], [1], [0, 0, 1, 1], [], []>} : vector<4x32xf32>, vector<32x16xf32>, vector<4x16xf32> -> vector<4x16xf32>
    %c0_9 = arith.constant 0 : index
    %c0_10 = arith.constant 0 : index
    %10 = vector.load %arg5[%c0_9, %c0_10] : memref<1x16xf32, #tpu.memory_space<vmem>>, vector<1x16xf32>
    %11 = vector.broadcast %10 : vector<1x16xf32> to vector<4x16xf32>
    %12 = arith.addf %9, %11 : vector<4x16xf32>
    %cst_11 = arith.constant 0.000000e+00 : f32
    %13 = vector.broadcast %cst_11 : f32 to vector<4x16xf32>
    %14 = arith.maximumf %12, %13 : vector<4x16xf32>
    %c0_12 = arith.constant 0 : index
    %c0_13 = arith.constant 0 : index
    %15 = vector.load %arg6[%c0_12, %c0_13] : memref<16x16xf32, #tpu.memory_space<vmem>>, vector<16x16xf32>
    %cst_14 = arith.constant dense<0.000000e+00> : vector<4x16xf32>
    %16 = tpu.matmul %14, %15, %cst_14 {dimension_numbers = #tpu.dot_dimension_numbers<[1], [0], [0], [1], [0, 0, 1, 1], [], []>} : vector<4x16xf32>, vector<16x16xf32>, vector<4x16xf32> -> vector<4x16xf32>
    %c0_15 = arith.constant 0 : index
    %c0_16 = arith.constant 0 : index
    %17 = vector.load %arg7[%c0_15, %c0_16] : memref<1x16xf32, #tpu.memory_space<vmem>>, vector<1x16xf32>
    %18 = vector.broadcast %17 : vector<1x16xf32> to vector<4x16xf32>
    %19 = arith.addf %16, %18 : vector<4x16xf32>
    %cst_17 = arith.constant 0.000000e+00 : f32
    %20 = vector.broadcast %cst_17 : f32 to vector<4x16xf32>
    %21 = arith.maximumf %19, %20 : vector<4x16xf32>
    %c0_18 = arith.constant 0 : index
    %c0_19 = arith.constant 0 : index
    %22 = vector.load %arg8[%c0_18, %c0_19] : memref<16x4xf32, #tpu.memory_space<vmem>>, vector<16x4xf32>
    %cst_20 = arith.constant dense<0.000000e+00> : vector<4x4xf32>
    %23 = tpu.matmul %21, %22, %cst_20 {dimension_numbers = #tpu.dot_dimension_numbers<[1], [0], [0], [1], [0, 0, 1, 1], [], []>} : vector<4x16xf32>, vector<16x4xf32>, vector<4x4xf32> -> vector<4x4xf32>
    %c0_21 = arith.constant 0 : index
    %c0_22 = arith.constant 0 : index
    %24 = vector.load %arg9[%c0_21, %c0_22] : memref<1x4xf32, #tpu.memory_space<vmem>>, vector<1x4xf32>
    %25 = vector.broadcast %24 : vector<1x4xf32> to vector<4x4xf32>
    %26 = arith.addf %23, %25 : vector<4x4xf32>
    %c0_23 = arith.constant 0 : index
    %c0_24 = arith.constant 0 : index
    %27 = vector.load %arg10[%c0_23, %c0_24] : memref<4x4xf32, #tpu.memory_space<vmem>>, vector<4x4xf32>
    tpu.vector_store %arg10[%c0_23, %c0_24], %26 {strides = array<i32>} : memref<4x4xf32, #tpu.memory_space<vmem>>, vector<4x4xf32>,
    return
  }
  func.func @transform_0(%arg0: i32) -> (i32, i32) {
    %c0_i32 = arith.constant 0 : i32
    %c0_i32_0 = arith.constant 0 : i32
    return %arg0, %c0_i32 : i32, i32
  }
  func.func @transform_1(%arg0: i32) -> (i32, i32) {
    %c0_i32 = arith.constant 0 : i32
    %c0_i32_0 = arith.constant 0 : i32
    %c0_i32_1 = arith.constant 0 : i32
    return %c0_i32, %c0_i32_0 : i32, i32
  }
  func.func @transform_2(%arg0: i32) -> (i32, i32) {
    %c0_i32 = arith.constant 0 : i32
    %c0_i32_0 = arith.constant 0 : i32
    %c0_i32_1 = arith.constant 0 : i32
    return %c0_i32, %c0_i32_0 : i32, i32
  }
  func.func @transform_3(%arg0: i32) -> (i32, i32) {
    %c0_i32 = arith.constant 0 : i32
    %c0_i32_0 = arith.constant 0 : i32
    %c0_i32_1 = arith.constant 0 : i32
    return %c0_i32, %c0_i32_0 : i32, i32
  }
  func.func @transform_4(%arg0: i32) -> (i32, i32) {
    %c0_i32 = arith.constant 0 : i32
    %c0_i32_0 = arith.constant 0 : i32
    %c0_i32_1 = arith.constant 0 : i32
    return %c0_i32, %c0_i32_0 : i32, i32
  }
  func.func @transform_5(%arg0: i32) -> (i32, i32) {
    %c0_i32 = arith.constant 0 : i32
    %c0_i32_0 = arith.constant 0 : i32
    %c0_i32_1 = arith.constant 0 : i32
    return %c0_i32, %c0_i32_0 : i32, i32
  }
  func.func @transform_6(%arg0: i32) -> (i32, i32) {
    %c0_i32 = arith.constant 0 : i32
    %c0_i32_0 = arith.constant 0 : i32
    %c0_i32_1 = arith.constant 0 : i32
    return %c0_i32, %c0_i32_0 : i32, i32
  }
  func.func @transform_7(%arg0: i32) -> (i32, i32) {
    %c0_i32 = arith.constant 0 : i32
    %c0_i32_0 = arith.constant 0 : i32
    %c0_i32_1 = arith.constant 0 : i32
    return %c0_i32, %c0_i32_0 : i32, i32
  }
  func.func @transform_8(%arg0: i32) -> (i32, i32) {
    %c0_i32 = arith.constant 0 : i32
    %c0_i32_0 = arith.constant 0 : i32
    %c0_i32_1 = arith.constant 0 : i32
    return %c0_i32, %c0_i32_0 : i32, i32
  }
  func.func @transform_9(%arg0: i32) -> (i32, i32) {
    %c0_i32 = arith.constant 0 : i32
    %c0_i32_0 = arith.constant 0 : i32
    return %arg0, %c0_i32 : i32, i32
  }
}

</mosaic_0001>

<bundles_post_ra>
// kernel: tpu_custom_call.1
= control target key start
LH: loop header
LB: loop body
LE: loop exit
PB: predicated region body
PF: predicated region fallthrough
CT: control target
= control target key end

     0   :  { %vm40_vm0 = vcmask 130048   ;;  %s312_s0 = inlined_call_operand.vmem [shape: f32[4,16], index: 0, kind: input, shape index: {}]   ;;  %s313_s1 = inlined_call_operand.vmem [shape: f32[16,32], index: 1, kind: input, shape index: {}]   ;;  %s314_s2 = inlined_call_operand.vmem [shape: f32[1,32], index: 2, kind: input, shape index: {}]   ;;  %s315_s3 = inlined_call_operand.vmem [shape: f32[32,16], index: 3, kind: input, shape index: {}]   ;;  %s316_s4 = inlined_call_operand.vmem [shape: f32[1,16], index: 4, kind: input, shape index: {}]   ;;  %s317_s5 = inlined_call_operand.vmem [shape: f32[16,16], index: 5, kind: input, shape index: {}]   ;;  %s318_s6 = inlined_call_operand.vmem [shape: f32[1,16], index: 6, kind: input, shape index: {}]   ;;  %s319_s7 = inlined_call_operand.vmem [shape: f32[16,4], index: 7, kind: input, shape index: {}]   ;;  %s320_s8 = inlined_call_operand.vmem [shape: f32[1,4], index: 8, kind: input, shape index: {}]   ;;  %s321_s9 = inlined_call_operand.hbm [shape: f32[4,4], index: 9, kind: output, shape index: {}]  }
   0x1   :  { %v35_v0 = vld [vmem:[%s313_s1 + $0x8] sm:$0xff]  ;;  %v34_v1 = vld [vmem:[%s313_s1] sm:$0xff]  ;;  %v68_v3 = vld [vmem:[%s315_s3 + $0x18] sm:$0xff] }
   0x2   :  { %58 = vmatpush.msra.mxu0 %v35_v0  ;;  %v33_v2 = vld [vmem:[%s312_s0] sm:$0xf]  ;;  %89 = vmatpush.msra.mxu1 %v68_v3 }
   0x4   :  { %59 = vmatpush.msra.mxu0 %v34_v1 }
   0x5   :  { %14 = vsyncpa [#allocation3], 0  ;;  %175 = vmatmul.msk.f32.vlgmr.msra.gmra.mxu0 %vm40_vm0, %v33_v2  ;;  %v67_v4 = vld [vmem:[%s315_s3 + $0x10] sm:$0xff]  ;;  %v66_v5 = vld [vmem:[%s315_s3 + $0x8] sm:$0xff]  ;;  %vm73_vm1 = vcmask 261120   ;;  %s210_s12 = smov [#allocation2]  }
   0x6   :  { %90 = vmatpush.msra.mxu1 %v67_v4  ;;  %v65_v6 = vld [vmem:[%s315_s3] sm:$0xff]  ;;  %v99_v11 = vld [vmem:[%s317_s5 + $0x8] sm:$0xff]  ;;  %s164_s13 = sshll.u32 %s210_s12, 4  ;;  %vm157_vm2 = vcmask 27648   ;;  %s165_s13 = int_to_ptr.vmem [resolvable:$true] %s164_s13 }
   0x7   :  { %v180_v7 = vld [vmem:[%s314_s2] ss:$0 sm:$0xff]  ;;  %121 = vmatpush.msra.mxu2 %v99_v11  ;;  %v129_v17 = vld [vmem:[%s319_s7 + $0x8] sm:$0xff] }
   0x8   :  { %91 = vmatpush.msra.mxu1 %v66_v5  ;;  %v98_v12 = vld [vmem:[%s317_s5] sm:$0xff]  ;;  %151 = vmatpush.msra.mxu3 %v129_v17 }
   0x9   :  { %122 = vmatpush.msra.mxu2 %v98_v12  ;;  %v181_v13 = vld [vmem:[%s316_s4] ss:$0 sm:$0xff] }
   0xa   :  { %92 = vmatpush.msra.mxu1 %v65_v6  ;;  %v128_v18 = vld [vmem:[%s319_s7] sm:$0xff]  ;;  %s166_s7 = sshll.u32 %s321_s9, 4  ;;  %s167_s7 = int_to_ptr.hbm [resolvable:$true] %s166_s7 }
   0xb   :  { %152 = vmatpush.msra.mxu3 %v128_v18  ;;  %v182_v19 = vld [vmem:[%s318_s6] ss:$0 sm:$0xff] }
   0xc   :  { %v183_v23 = vld [vmem:[%s320_s8] ss:$0 sm:$0xff] }
  0x82   :  { %v61_v8 = vpop.f32.mrf.mxu0 }
  0x83   :  { %v62_v9 = vadd.f32 %v180_v7, %v61_v8 }
  0x85   :  { %v64_v10 = vmax.f32 %v62_v9, 0.0 }
  0x87   :  { %176 = vmatmul.msk.f32.vlgmr.msra.gmra.mxu1 %vm73_vm1, %v64_v10 }
 0x104   :  { %v94_v14 = vpop.f32.mrf.mxu1 }
 0x105   :  { %v95_v15 = vadd.f32 %v181_v13, %v94_v14 }
 0x107   :  { %v97_v16 = vmax.f32 %v95_v15, 0.0 }
 0x109   :  { %177 = vmatmul.msk.f32.vlgmr.msra.gmra.mxu2 %vm40_vm0, %v97_v16 }
 0x18c   :  { %v124_v20 = vpop.f32.mrf.mxu2 }
 0x18d   :  { %v125_v21 = vadd.f32 %v182_v19, %v124_v20 }
 0x18f   :  { %v127_v22 = vmax.f32 %v125_v21, 0.0 }
 0x191   :  { %178 = vmatmul.msk.f32.vlgmr.msra.gmra.mxu3 %vm40_vm0, %v127_v22 }
 0x214   :  { %v154_v24 = vpop.f32.mrf.mxu3 }
 0x215   :  { %v155_v25 = vadd.f32 %v183_v23, %v154_v24 }
 0x217   :  { %158 = vst.msk [vmem:[#allocation2] sm:$0xf] %vm157_vm2, %v155_v25 }
 0x218   :  { %169 = dma.vmem_to_hbm [thread:$0]  %s165_s13, 64, %s167_s7, [#allocation3]  }
 0x219   :  { %208 = dma.done.wait [#allocation3], 64  }
 0x21a   :  { %209 = vsyncadd [#allocation3], 4294967232 }
 0x21b   :  { %174 = vsyncpa [#allocation3], 1 }

</bundles_post_ra>
